<compile_context>
chip_gen: v5e
topology: v5e:2x2
jax: 0.10.0
libtpu: 0.0.40
codegen_flags: <defaults>
</compile_context>

<pallas_src>
import functools

import jax
import jax.numpy as jnp
from jax.experimental import pallas as pl
from jax.experimental.pallas import tpu as pltpu


def _ipow(x, n):
    """x**n for a static integer n >= 1 via exponentiation-by-squaring (VPU only)."""
    acc = None
    base = x
    while n > 0:
        if n & 1:
            acc = base if acc is None else acc * base
        n >>= 1
        if n:
            base = base * base
    return acc


def _gem_kernel_static_p(x_ref, o_ref, *, eps, p_int, inv_p, cr):
    # x_ref: (TR, S) VMEM tile of the input (native dtype);  o_ref: (TR, 1)
    tr, s = x_ref.shape
    inv_s = 1.0 / s

    def chunk(r0, n):
        xb = x_ref[pl.ds(r0, n), :].astype(jnp.float32)
        xc = jnp.maximum(xb, eps)                    # clamp(min=eps)
        xp = _ipow(xc, p_int)                        # VALU-only power (no EUP)
        m = jnp.sum(xp, axis=-1, keepdims=True) * inv_s
        res = m if p_int == 1 else m ** inv_p        # 1/p root on (n, 1) only
        o_ref[pl.ds(r0, n), :] = res.astype(o_ref.dtype)

    n_full = tr // cr
    rem = tr - n_full * cr
    if n_full == 1:
        chunk(0, cr)
    elif n_full > 1:
        @pl.loop(0, n_full)
        def _(c):
            chunk(pl.multiple_of(c * cr, cr), cr)
    if rem:
        chunk(n_full * cr, rem)


def _gem_kernel_traced_p(p_ref, x_ref, o_ref, *, eps, cr):
    # Fallback for a genuinely traced / non-integer p: exp/log power on the EUP.
    p = p_ref[0]
    inv_p = 1.0 / p
    tr, s = x_ref.shape
    inv_s = 1.0 / s

    def chunk(r0, n):
        xb = x_ref[pl.ds(r0, n), :].astype(jnp.float32)
        xc = jnp.maximum(xb, eps)                    # xc >= eps > 0, log finite
        xp = jnp.exp(p * jnp.log(xc))
        m = jnp.sum(xp, axis=-1, keepdims=True) * inv_s
        o_ref[pl.ds(r0, n), :] = jnp.exp(jnp.log(m) * inv_p).astype(o_ref.dtype)

    n_full = tr // cr
    rem = tr - n_full * cr
    if n_full == 1:
        chunk(0, cr)
    elif n_full > 1:
        @pl.loop(0, n_full)
        def _(c):
            chunk(pl.multiple_of(c * cr, cr), cr)
    if rem:
        chunk(n_full * cr, rem)


def gem(x, p, eps=1e-6):
    """GeM pooling.  x: (B, C, H, W); p: scalar / shape-(1,) param.  -> (B, C, 1, 1)."""
    B, C, H, W = x.shape
    R, S = B * C, H * W
    x2d = x.reshape(R, S)        # rows = (b, c); spatial reduction along lanes
    # TODO(synk): when H*W is not a multiple of 128 (e.g. 7x7 maps) the (tr, S)
    # tile wastes lanes; an NHWC-style producer layout (channels on lanes)
    # would recover ~2.6x DMA/VPU efficiency — out of scope for NCHW drop-in.

    itemsize = jnp.dtype(x.dtype).itemsize
    s_pad = ((S + 127) // 128) * 128                 # lane-padded row width

    # ---- compute-chunk rows: cap the ~4 live f32 temporaries of one chunk at
    # ~4 MiB regardless of how big the DMA tile is.
    cr = (1024 * 1024) // (s_pad * 4)                # ~1 MiB per live f32 copy
    cr = max(8, min(1024, (cr // 16) * 16))          # sublane-friendly (bf16: 16)

    # ---- VMEM budget from the actual chip (v7x: 64 MiB/TC, v5e/v6e: 128 MiB).
    try:
        vmem_cap = int(pltpu.get_tpu_info().vmem_capacity_bytes)
    except Exception:
        vmem_cap = 64 * 1024 * 1024                  # conservative (v7x) fallback
    vmem_limit = max(16 * 1024 * 1024, min(vmem_cap // 2, 96 * 1024 * 1024))

    temp_bytes = 4 * cr * s_pad * 4                  # in-kernel f32 chunk temps
    # Per row, double-buffered: input row (native dtype, lane-padded) plus the
    # lane-padded (tr, 1) output row.
    per_row = 2 * s_pad * itemsize + 2 * 128 * itemsize
    budget = max(4 * 1024 * 1024, (3 * vmem_limit) // 4 - temp_bytes)
    tr = budget // per_row
    tr = max(cr, min(16384, (tr // cr) * cr))        # multiple of the chunk size
    tr = min(tr, R)                                  # full-dim block if R small
    cr_k = min(cr, tr)

    grid = (pl.cdiv(R, tr),)
    # NOTE: rows of a final partial tile hold stale VMEM; their per-row results
    # are garbage but the writeback is masked, so outputs stay correct.

    # ---- resolve p: specialise the common concrete small-integer case (p=3).
    try:
        p_static = float(jnp.asarray(p).reshape(()).item())   # raises if traced
    except Exception:
        p_static = None
    use_int = (p_static is not None and p_static == round(p_static)
               and 1 <= int(round(p_static)) <= 8)

    if use_int:
        p_int = int(round(p_static))
        kernel = functools.partial(_gem_kernel_static_p, eps=float(eps),
                                   p_int=p_int, inv_p=1.0 / p_static, cr=cr_k)
        in_specs = [pl.BlockSpec((tr, S), lambda i: (i, 0))]
        args = (x2d,)
        flops = (p_int + 1) * R * S
        transcendentals = 2 * R                      # only the per-row 1/p root
    else:
        kernel = functools.partial(_gem_kernel_traced_p, eps=float(eps), cr=cr_k)
        in_specs = [pl.BlockSpec(memory_space=pltpu.SMEM),   # p (learnable scalar)
                    pl.BlockSpec((tr, S), lambda i: (i, 0))]
        args = (jnp.asarray(p, jnp.float32).reshape((1,)), x2d)
        flops = 3 * R * S
        transcendentals = 2 * R * S + 2 * R

    out2d = pl.pallas_call(
        kernel,
        out_shape=jax.ShapeDtypeStruct((R, 1), x.dtype),
        grid_spec=pltpu.PrefetchScalarGridSpec(
            num_scalar_prefetch=0,
            grid=grid,
            in_specs=in_specs,
            out_specs=pl.BlockSpec((tr, 1), lambda i: (i, 0)),
        ),
        compiler_params=pltpu.CompilerParams(
            # TODO(synk): on v7x, verify in the trace that this parallel row
            # axis shards across both TensorCores; else use CORE_PARALLEL.
            dimension_semantics=("parallel",),
            vmem_limit_bytes=vmem_limit,
        ),
        cost_estimate=pl.CostEstimate(
            flops=flops,
            transcendentals=transcendentals,
            bytes_accessed=R * S * itemsize + R * itemsize,
        ),
    )(*args)

    return out2d.reshape(B, C, 1, 1)


if __name__ == "__main__":
    key = jax.random.PRNGKey(0)
    B, C, H, W = 2, 4, 16, 16
    x = jax.random.uniform(key, (B, C, H, W), dtype=jnp.float32)
    eps = 1e-6

    # GeM.__init__ default: p = ones(1) * 3 -> concrete integer, takes the
    # specialised multiply-only power path.
    p = jnp.ones((1,), dtype=jnp.float32) * 3.0
    out = jax.block_until_ready(gem(x, p, eps))

    ref = jnp.power(
        jnp.mean(jnp.power(jnp.maximum(x, eps), p[0]), axis=(2, 3), keepdims=True),
        1.0 / p[0])
    assert out.shape == (B, C, 1, 1)
    assert out.dtype == x.dtype
    assert jnp.allclose(out, ref, rtol=1e-4, atol=1e-5)

    # Non-integer p exercises the exp/log fallback kernel.
    p2 = jnp.ones((1,), dtype=jnp.float32) * 3.5
    out2 = jax.block_until_ready(gem(x, p2, eps))
    ref2 = jnp.power(
        jnp.mean(jnp.power(jnp.maximum(x, eps), p2[0]), axis=(2, 3), keepdims=True),
        1.0 / p2[0])
    assert jnp.allclose(out2, ref2, rtol=1e-4, atol=1e-5)

    print("KERNEL_OK")
</pallas_src>

<mosaic_0001>
module attributes {stable_mosaic.version = 11 : i64} {
  func.func @_gem_kernel_static_p(%arg0: i32, %arg1: memref<8x256xf32, #tpu.memory_space<vmem>>, %arg2: memref<8x1xf32, #tpu.memory_space<vmem>>) attributes {dimension_semantics = [#tpu.dimension_semantics<parallel>], iteration_bounds = array<i64: 1>, scalar_prefetch = 0 : i64, scratch_operands = 0 : i64, tpu.core_type = #tpu.core_type<tc>, window_params = [{transform_indices = @transform_0, window_bounds = array<i64: 8, 256>}, {transform_indices = @transform_1, window_bounds = array<i64: 8, 1>}]} {
    %c0 = arith.constant 0 : index
    %c0_0 = arith.constant 0 : index
    %0 = vector.load %arg1[%c0, %c0_0] : memref<8x256xf32, #tpu.memory_space<vmem>>, vector<8x256xf32>
    %cst = arith.constant 9.99999997E-7 : f32
    %1 = vector.broadcast %cst : f32 to vector<8x256xf32>
    %2 = arith.maximumf %0, %1 : vector<8x256xf32>
    %3 = arith.mulf %2, %2 : vector<8x256xf32>
    %4 = arith.mulf %2, %3 : vector<8x256xf32>
    %cst_1 = arith.constant dense<0.000000e+00> : vector<8xf32>
    %5 = vector.multi_reduction <add>, %4, %cst_1 [1] : vector<8x256xf32> to vector<8xf32>
    %6 = vector.shape_cast %5 : vector<8xf32> to vector<8x1xf32>
    %cst_2 = arith.constant 3.906250e-03 : f32
    %7 = vector.broadcast %cst_2 : f32 to vector<8x1xf32>
    %8 = arith.mulf %6, %7 : vector<8x1xf32>
    %cst_3 = arith.constant 0.333333343 : f32
    %9 = vector.broadcast %cst_3 : f32 to vector<8x1xf32>
    %10 = math.powf %8, %9 : vector<8x1xf32>
    %c0_4 = arith.constant 0 : index
    %c0_5 = arith.constant 0 : index
    %11 = vector.load %arg2[%c0_4, %c0_5] : memref<8x1xf32, #tpu.memory_space<vmem>>, vector<8x1xf32>
    tpu.vector_store %arg2[%c0_4, %c0_5], %10 {strides = array<i32>} : memref<8x1xf32, #tpu.memory_space<vmem>>, vector<8x1xf32>,
    return
  }
  func.func @transform_0(%arg0: i32) -> (i32, i32) {
    %c0_i32 = arith.constant 0 : i32
    %c0_i32_0 = arith.constant 0 : i32
    return %arg0, %c0_i32 : i32, i32
  }
  func.func @transform_1(%arg0: i32) -> (i32, i32) {
    %c0_i32 = arith.constant 0 : i32
    %c0_i32_0 = arith.constant 0 : i32
    return %arg0, %c0_i32 : i32, i32
  }
}

</mosaic_0001>

<bundles_post_ra>
// kernel: tpu_custom_call.1
= control target key start
LH: loop header
LB: loop body
LE: loop exit
PB: predicated region body
PF: predicated region fallthrough
CT: control target
= control target key end

     0   :  { %6 = vsyncpa [#allocation3], 0  ;;  %s97_s9 = smov [#allocation2]   ;;  %s114_s0 = inlined_call_operand.hbm [shape: f32[8,256], index: 0, kind: input, shape index: {}]   ;;  %s115_s1 = inlined_call_operand.vmem [shape: f32[8,1], index: 1, kind: output, shape index: {}]  }
   0x1   :  { %s12_s8 = sshll.u32 %s114_s0, 4  ;;  %s14_s10 = sshll.u32 %s97_s9, 4  ;;  %s13_s8 = int_to_ptr.hbm [resolvable:$true] %s12_s8  ;;  %s15_s10 = int_to_ptr.vmem [resolvable:$true] %s14_s10 }
   0x2   :  { %17 = dma.hbm_to_vmem [thread:$0]  %s13_s8, 256, %s15_s10, [#allocation3]  }
   0x3   :  { %95 = dma.done.wait [#allocation3], 256  }
   0x4   :  { %96 = vsyncadd [#allocation3], 4294967040  ;;  %v22_v0 = vld [vmem:[#allocation2] sm:$0xff]  ;;  %v23_v1 = vld [vmem:[#allocation2 + $0x8] sm:$0xff]  ;;  %vm35_vm4 = vcmask 7168  }
   0x5   :  { %v24_v2 = vmax.f32 %v22_v0, 1e-06  ;;  %v25_v3 = vmax.f32 %v23_v1, 1e-06 }
   0x7   :  { %v26_v4 = vmul.f32 %v24_v2, %v24_v2  ;;  %v27_v5 = vmul.f32 %v25_v3, %v25_v3 }
   0x9   :  { %v28_v6 = vmul.f32 %v26_v4, %v24_v2  ;;  %v29_v7 = vmul.f32 %v27_v5, %v25_v3 }
   0xb   :  { %v30_v8 = vadd.f32 %v29_v7, %v28_v6 }
   0xd   :  { %31 = vadd.xlane.f32.xlu0 %v30_v8 }
  0x80   :  { %v32_v9 = vpop.xlane.xlu0 %31 }
  0x81   :  { %v33_v10 = vmul.f32 0.00390625, %v32_v9 }
  0x83   :  { %v44_v11 = vand.u32 2147483647, %v33_v10  ;;  %v61_v23 = vand.u32 2147483648, %v33_v10  ;;  %vm43_vm2 = vcmp.lt.f32.partialorder %v33_v10, 0.0  ;;  %vm42_vm3 = vcmp.eq.f32.partialorder %v33_v10, 0.0 }
  0x85   :  { %67 = vlog2.f32 %v44_v11  ;;  %vm58_vm0 = vweird.f32 %v44_v11  ;;  %vm60_vm1 = vcmp.eq.f32.partialorder %v44_v11, 0.0  ;;  %vm45_vm5 = vcmp.eq.f32.partialorder %v44_v11, inf }
  0x8b   :  { %v68_v12 = vpop.eup %67 }
  0x8c   :  { %v48_v13 = vmul.f32 -0.33333334, %v68_v12 }
  0x8e   :  { %69 = vpow2.f32 %v48_v13 }
  0x94   :  { %v70_v14 = vpop.eup %69 }
  0x95   :  { %v50_v15 = vmul.f32 %v70_v14, %v70_v14 }
  0x97   :  { %v51_v16 = vmul.f32 %v50_v15, %v44_v11 }
  0x99   :  { %v52_v17 = vmul.f32 %v51_v16, %v50_v15 }
  0x9b   :  { %v53_v18 = vsub.f32 %v52_v17, %v70_v14 }
  0x9d   :  { %v54_v19 = vmul.f32 -0.33333334, %v53_v18 }
  0x9f   :  { %v55_v20 = vadd.f32 %v70_v14, %v54_v19 }
  0xa1   :  { %v56_v21 = vmul.f32 %v55_v20, %v33_v10 }
  0xa3   :  { %v57_v22 = vmul.f32 %v56_v21, %v55_v20 }
  0xa5   :  { %v59_v24 = vsel %vm58_vm0, %v33_v10, %v57_v22 }
  0xa6   :  { %v62_v25 = vsel %vm60_vm1, %v61_v23, %v59_v24 }
  0xa7   :  { %v63_v26 = vsel %vm43_vm2, nan, %v62_v25 }
  0xa8   :  { %v64_v27 = vsel %vm42_vm3, 0.0, %v63_v26 }
  0xa9   :  { %v65_v28 = vsel %vm45_vm5, inf, %v64_v27 }
  0xaa   :  { %36 = vst.msk [vmem:[%s115_s1] sm:$0xff] %vm35_vm4, %v65_v28 }
  0xab   :  { %41 = vsyncpa [#allocation3], 1 }

</bundles_post_ra>
